<compile_context>
chip_gen: v5e
topology: v5e:2x2
jax: 0.10.0
libtpu: 0.0.40
codegen_flags: <defaults>
</compile_context>

<pallas_src>
import jax
import jax.numpy as jnp
from jax.experimental import pallas as pl
from jax.experimental.pallas import tpu as pltpu


def _pick_spatial_tile(n_pos):
    """Largest lane-aligned spatial tile that divides n_pos (else full extent)."""
    for cand in (2048, 1024, 512, 256, 128):
        if n_pos % cand == 0:
            return cand
    return n_pos


def _make_conv_block_kernel(bn, normalization, activation, alpha, eps):
    """Fused conv(matmul) + norm + activation kernel body.

    p_ref : (bn, CK, tP)  bf16 im2col patches, spatial-minor (lane-dense)
    w_ref : (Cout, CK)    bf16 flattened conv weight (OIHW flatten)
    b_ref : (Cout, 1)     f32 conv bias
    o_ref : (bn, Cout, tP)
    acc_ref: (bn, Cout, tP) f32 VMEM scratch (used only by the batch-norm path)
    """

    def apply_act(y):
        if activation == "relu":
            return jnp.maximum(y, 0.0)
        if activation == "lrelu":
            return jnp.where(y >= 0.0, y, alpha * y)
        if activation == "prelu":
            # nn.PReLU default init: single slope = 0.25 (treated as constant).
            return jnp.where(y >= 0.0, y, 0.25 * y)
        if activation == "tanh":
            return jnp.tanh(y)  # EUP
        return y

    def kernel(p_ref, w_ref, b_ref, o_ref, acc_ref):
        w = w_ref[...]  # (Cout, CK) bf16

        if normalization == "batch":
            # Whole batch resident in this single program (bn == N): per-sample
            # MXU matmuls into f32 scratch, then exact batch statistics.
            # TODO(synk): running_mean/var bookkeeping of BatchNorm2d (buffers)
            # is not part of the forward output and is not emulated here.
            for b in range(bn):
                acc_ref[b] = jnp.dot(w, p_ref[b], preferred_element_type=jnp.float32)
            y = acc_ref[...]  # (bn, Cout, tP) f32
            # Bias skipped: exactly cancelled by the mean subtraction.
            mu = jnp.mean(y, axis=(0, 2), keepdims=True)
            var = jnp.mean(jnp.square(y - mu), axis=(0, 2), keepdims=True)
            y = (y - mu) * jax.lax.rsqrt(var + eps)  # rsqrt -> EUP
            o_ref[...] = apply_act(y).astype(o_ref.dtype)
        else:
            # bn == 1: one sample per program; single lane-dense 2D matmul
            # (Cout, CK) @ (CK, tP) on the MXU, f32 accumulation.
            y = jnp.dot(w, p_ref[0], preferred_element_type=jnp.float32)  # (Cout, tP)
            if normalization == "instance":
                # Bias skipped (cancelled by mean subtraction). Stats over the
                # full spatial extent (tP == nP on this path).
                mu = jnp.mean(y, axis=1, keepdims=True)
                var = jnp.mean(jnp.square(y - mu), axis=1, keepdims=True)
                y = (y - mu) * jax.lax.rsqrt(var + eps)
            else:
                y = y + b_ref[...]  # (Cout, 1) broadcasts over lanes
            o_ref[0] = apply_act(y).astype(o_ref.dtype)

    return kernel


def conv_block_forward(
    x,
    weight,
    bias,
    *,
    stride=2,
    padding=1,
    normalization=None,
    activation=None,
    alpha=0.2,
    eps=1e-5,
):
    """Forward pass of the Conv block. x: (N, Cin, H, W) NCHW, weight: (Cout, Cin, K, K)."""
    N, Cin, H, W = x.shape
    Cout, _, K, _ = weight.shape
    S, P = stride, padding
    Hout = (H + 2 * P - K) // S + 1
    Wout = (W + 2 * P - K) // S + 1
    nP = Hout * Wout
    CK = Cin * K * K

    # --- im2col in spatial-minor (N, CK, nP) layout, bf16 matmul operands ---
    # TODO(synk): fully fuse the patch construction into the kernel (build the
    # (CK, tile) block from a VMEM-resident padded input tile) so the
    # K*K/stride^2-duplicated patches never round-trip through HBM.
    xp = jnp.pad(x, ((0, 0), (0, 0), (P, P), (P, P)))
    cols = []
    for kh in range(K):
        for kw in range(K):
            cols.append(
                xp[:, :, kh : kh + S * (Hout - 1) + 1 : S, kw : kw + S * (Wout - 1) + 1 : S]
            )
    patches = jnp.stack(cols, axis=2)                 # (N, Cin, K*K, Hout, Wout)
    patches = patches.reshape(N, CK, nP)              # ci-major, (kh,kw) next: matches OIHW flatten
    patches = patches.astype(jnp.bfloat16)

    w2d = weight.reshape(Cout, CK).astype(jnp.bfloat16)   # (Cout, CK)
    b2d = bias.reshape(Cout, 1).astype(jnp.float32)       # (Cout, 1)

    # --- grid / tiling ---
    if normalization == "batch":
        bn = N              # batch statistics need the whole batch in one program
    else:
        bn = 1              # per-sample programs: instance-norm local, megacore-parallel
    tile_p = nP if normalization is not None else _pick_spatial_tile(nP)
    grid = (N // bn, nP // tile_p)

    kernel = _make_conv_block_kernel(bn, normalization, activation, alpha, eps)

    # VMEM budget: double-buffered input blocks + weights/bias + output block
    # + f32 temporaries, with headroom; clamp to <=32 MiB (valid on v7x too).
    out_itemsize = jnp.dtype(x.dtype).itemsize
    est = (
        2 * (bn * CK * tile_p * 2 + Cout * CK * 2 + Cout * 4)
        + 2 * bn * Cout * tile_p * out_itemsize
        + 4 * bn * Cout * tile_p * 4
    )
    vmem_limit = int(min(32 << 20, max(4 << 20, 8 * est)))

    sem0 = "arbitrary" if normalization == "batch" else "parallel"
    sem1 = "parallel" if normalization is None else "arbitrary"

    out = pl.pallas_call(
        kernel,
        out_shape=jax.ShapeDtypeStruct((N, Cout, nP), x.dtype),
        grid=grid,
        in_specs=[
            pl.BlockSpec((bn, CK, tile_p), lambda n, p: (n, 0, p)),
            pl.BlockSpec((Cout, CK), lambda n, p: (0, 0)),
            pl.BlockSpec((Cout, 1), lambda n, p: (0, 0)),
        ],
        out_specs=pl.BlockSpec((bn, Cout, tile_p), lambda n, p: (n, 0, p)),
        scratch_shapes=[pltpu.VMEM((bn, Cout, tile_p), jnp.float32)],
        compiler_params=pltpu.CompilerParams(
            dimension_semantics=(sem0, sem1),
            vmem_limit_bytes=vmem_limit,
        ),
    )(patches, w2d, b2d)

    # (N, Cout, nP) -> NCHW is a pure reshape: no transpose pass in HBM.
    return out.reshape(N, Cout, Hout, Wout)


def _reference(x, weight, bias, stride, padding, normalization, activation, alpha, eps):
    """Pure-JAX reference (XLA conv) matching the kernel's bf16/f32-acc numerics."""
    y = jax.lax.conv_general_dilated(
        x.astype(jnp.bfloat16),
        weight.astype(jnp.bfloat16),
        (stride, stride),
        [(padding, padding), (padding, padding)],
        dimension_numbers=("NCHW", "OIHW", "NCHW"),
        preferred_element_type=jnp.float32,
    )
    y = y + bias.astype(jnp.float32)[None, :, None, None]
    if normalization == "instance":
        mu = jnp.mean(y, axis=(2, 3), keepdims=True)
        var = jnp.mean((y - mu) ** 2, axis=(2, 3), keepdims=True)
        y = (y - mu) * jax.lax.rsqrt(var + eps)
    elif normalization == "batch":
        mu = jnp.mean(y, axis=(0, 2, 3), keepdims=True)
        var = jnp.mean((y - mu) ** 2, axis=(0, 2, 3), keepdims=True)
        y = (y - mu) * jax.lax.rsqrt(var + eps)
    if activation == "relu":
        y = jnp.maximum(y, 0.0)
    elif activation == "lrelu":
        y = jnp.where(y >= 0.0, y, alpha * y)
    elif activation == "prelu":
        y = jnp.where(y >= 0.0, y, 0.25 * y)
    elif activation == "tanh":
        y = jnp.tanh(y)
    return y.astype(x.dtype)


if __name__ == "__main__":
    # Module config: Conv(in_channels=4, out_channels=8, kernel_size=4, stride=2, padding=1)
    in_channels, out_channels, K, S, P = 4, 8, 4, 2, 1
    alpha = 0.2

    key = jax.random.PRNGKey(0)
    kx, kw, kb = jax.random.split(key, 3)

    x = jax.random.normal(kx, (2, in_channels, 16, 16), dtype=jnp.float32)

    # Deterministic parameter init, matching PyTorch Conv2d default ranges
    # (kaiming_uniform(a=sqrt(5)) -> U(-1/sqrt(fan_in), 1/sqrt(fan_in))).
    fan_in = in_channels * K * K
    bound = 1.0 / jnp.sqrt(jnp.float32(fan_in))
    weight = jax.random.uniform(
        kw, (out_channels, in_channels, K, K), jnp.float32, -bound, bound
    )
    bias = jax.random.uniform(kb, (out_channels,), jnp.float32, -bound, bound)

    # Primary config (instance + lrelu) plus the other code paths.
    configs = [("instance", "lrelu"), (None, "relu"), ("batch", "tanh")]
    for normalization, activation in configs:
        out = jax.block_until_ready(
            conv_block_forward(
                x,
                weight,
                bias,
                stride=S,
                padding=P,
                normalization=normalization,
                activation=activation,
                alpha=alpha,
            )
        )
        ref = _reference(x, weight, bias, S, P, normalization, activation, alpha, 1e-5)
        assert out.shape == ref.shape == (2, out_channels, 8, 8), (out.shape, ref.shape)
        err = float(jnp.max(jnp.abs(out - ref)))
        assert jnp.allclose(out, ref, atol=1e-2, rtol=1e-2), (normalization, activation, err)

    print("KERNEL_OK")
</pallas_src>

<mosaic_0001>
module attributes {stable_mosaic.version = 11 : i64} {
  func.func @kernel(%arg0: i32, %arg1: i32, %arg2: memref<1x64x64xbf16, #tpu.memory_space<vmem>>, %arg3: memref<8x64xbf16, #tpu.memory_space<vmem>>, %arg4: memref<8x1xf32, #tpu.memory_space<vmem>>, %arg5: memref<1x8x64xf32, #tpu.memory_space<vmem>>, %arg6: memref<1x8x64xf32, #tpu.memory_space<vmem>>) attributes {dimension_semantics = [#tpu.dimension_semantics<parallel>, #tpu.dimension_semantics<arbitrary>], iteration_bounds = array<i64: 2, 1>, scalar_prefetch = 0 : i64, scratch_operands = 1 : i64, tpu.core_type = #tpu.core_type<tc>, window_params = [{transform_indices = @transform_0, window_bounds = array<i64: 1, 64, 64>}, {pipeline_mode = #tpu.pipeline_mode<synchronous>, transform_indices = @transform_1, window_bounds = array<i64: 8, 64>}, {pipeline_mode = #tpu.pipeline_mode<synchronous>, transform_indices = @transform_2, window_bounds = array<i64: 8, 1>}, {transform_indices = @transform_3, window_bounds = array<i64: 1, 8, 64>}]} {
    %c0 = arith.constant 0 : index
    %c0_0 = arith.constant 0 : index
    %0 = vector.load %arg3[%c0, %c0_0] : memref<8x64xbf16, #tpu.memory_space<vmem>>, vector<8x64xbf16>
    %c0_1 = arith.constant 0 : index
    %c0_2 = arith.constant 0 : index
    %c0_3 = arith.constant 0 : index
    %1 = vector.load %arg2[%c0_1, %c0_2, %c0_3] : memref<1x64x64xbf16, #tpu.memory_space<vmem>>, vector<1x64x64xbf16>
    %2 = vector.shape_cast %1 : vector<1x64x64xbf16> to vector<64x64xbf16>
    %cst = arith.constant dense<0.000000e+00> : vector<8x64xf32>
    %3 = tpu.matmul %0, %2, %cst {dimension_numbers = #tpu.dot_dimension_numbers<[1], [0], [0], [1], [0, 0, 1, 1], [], []>} : vector<8x64xbf16>, vector<64x64xbf16>, vector<8x64xf32> -> vector<8x64xf32>
    %cst_4 = arith.constant dense<0.000000e+00> : vector<8xf32>
    %4 = vector.multi_reduction <add>, %3, %cst_4 [1] : vector<8x64xf32> to vector<8xf32>
    %5 = vector.shape_cast %4 : vector<8xf32> to vector<8x1xf32>
    %cst_5 = arith.constant 6.400000e+01 : f32
    %6 = vector.broadcast %cst_5 : f32 to vector<8x1xf32>
    %7 = arith.divf %5, %6 : vector<8x1xf32>
    %8 = vector.broadcast %7 : vector<8x1xf32> to vector<8x64xf32>
    %9 = arith.subf %3, %8 : vector<8x64xf32>
    %10 = arith.mulf %9, %9 : vector<8x64xf32>
    %cst_6 = arith.constant dense<0.000000e+00> : vector<8xf32>
    %11 = vector.multi_reduction <add>, %10, %cst_6 [1] : vector<8x64xf32> to vector<8xf32>
    %12 = vector.shape_cast %11 : vector<8xf32> to vector<8x1xf32>
    %cst_7 = arith.constant 6.400000e+01 : f32
    %13 = vector.broadcast %cst_7 : f32 to vector<8x1xf32>
    %14 = arith.divf %12, %13 : vector<8x1xf32>
    %15 = vector.broadcast %7 : vector<8x1xf32> to vector<8x64xf32>
    %16 = arith.subf %3, %15 : vector<8x64xf32>
    %cst_8 = arith.constant 9.99999974E-6 : f32
    %17 = vector.broadcast %cst_8 : f32 to vector<8x1xf32>
    %18 = arith.addf %14, %17 : vector<8x1xf32>
    %19 = math.rsqrt %18 : vector<8x1xf32>
    %20 = vector.broadcast %19 : vector<8x1xf32> to vector<8x64xf32>
    %21 = arith.mulf %16, %20 : vector<8x64xf32>
    %cst_9 = arith.constant 0.000000e+00 : f32
    %22 = vector.broadcast %cst_9 : f32 to vector<8x64xf32>
    %23 = arith.cmpf oge, %21, %22 : vector<8x64xf32>
    %cst_10 = arith.constant 2.000000e-01 : f32
    %24 = vector.broadcast %cst_10 : f32 to vector<8x64xf32>
    %25 = arith.mulf %24, %21 : vector<8x64xf32>
    %26 = arith.select %23, %21, %25 : vector<8x64xi1>, vector<8x64xf32>
    %c0_11 = arith.constant 0 : index
    %c0_12 = arith.constant 0 : index
    %c0_13 = arith.constant 0 : index
    %27 = vector.load %arg5[%c0_11, %c0_12, %c0_13] : memref<1x8x64xf32, #tpu.memory_space<vmem>>, vector<1x8x64xf32>
    %28 = vector.shape_cast %27 : vector<1x8x64xf32> to vector<8x64xf32>
    %29 = vector.shape_cast %26 : vector<8x64xf32> to vector<1x8x64xf32>
    tpu.vector_store %arg5[%c0_11, %c0_12, %c0_13], %29 {strides = array<i32>} : memref<1x8x64xf32, #tpu.memory_space<vmem>>, vector<1x8x64xf32>,
    return
  }
  func.func @transform_0(%arg0: i32, %arg1: i32) -> (i32, i32, i32) {
    %c0_i32 = arith.constant 0 : i32
    %c0_i32_0 = arith.constant 0 : i32
    return %arg0, %c0_i32, %arg1 : i32, i32, i32
  }
  func.func @transform_1(%arg0: i32, %arg1: i32) -> (i32, i32) {
    %c0_i32 = arith.constant 0 : i32
    %c0_i32_0 = arith.constant 0 : i32
    %c0_i32_1 = arith.constant 0 : i32
    return %c0_i32, %c0_i32_0 : i32, i32
  }
  func.func @transform_2(%arg0: i32, %arg1: i32) -> (i32, i32) {
    %c0_i32 = arith.constant 0 : i32
    %c0_i32_0 = arith.constant 0 : i32
    %c0_i32_1 = arith.constant 0 : i32
    return %c0_i32, %c0_i32_0 : i32, i32
  }
  func.func @transform_3(%arg0: i32, %arg1: i32) -> (i32, i32, i32) {
    %c0_i32 = arith.constant 0 : i32
    %c0_i32_0 = arith.constant 0 : i32
    return %arg0, %c0_i32, %arg1 : i32, i32, i32
  }
}

</mosaic_0001>

<bundles_post_ra>
// kernel: tpu_custom_call.1
= control target key start
LH: loop header
LB: loop body
LE: loop exit
PB: predicated region body
PF: predicated region fallthrough
CT: control target
= control target key end

     0   :  { %8 = vsyncpa [#allocation4], 0  ;;  %s760_s0 = inlined_call_operand.hbm [shape: bf16[2,64,64], index: 0, kind: input, shape index: {}]   ;;  %s761_s1 = inlined_call_operand.vmem [shape: bf16[8,64], index: 1, kind: input, shape index: {}]   ;;  %s762_s2 = inlined_call_operand.vmem [shape: f32[8,1], index: 2, kind: input, shape index: {}]   ;;  %s763_s3 = inlined_call_operand.hbm [shape: f32[2,8,64], index: 3, kind: output, shape index: {}]  }
   0x1   :  { %10 = vsyncpa [#allocation4 + $0x1], 0 }
   0x2   :  { %11 = vsyncpa [#allocation5], 0 }
   0x3   :  { %13 = vsyncpa [#allocation5 + $0x1], 0  ;;  %s632_s12 = smov 0   ;;  %s634_s13 = smov 0  }
   0x4   :  { %s636_s14 = smov 0   ;;  %s638_s15 = smov 0  }
   0x5   :  { %s640_s16 = smov 0   ;;  %s642_s17 = smov 0  }
   0x6 LB: > { %s390_s2 = sadd.s32 4294967295, %s607_s17   ;;  %s391_s18 = sadd.s32 4294967294, %s607_s17   ;;  %s607_s17 = sphi %s642_s17, %s19_s17   ;;  %s603_s16 = sphi %s640_s16, %s772_s16   ;;  %s599_s15 = sphi %s638_s15, %s771_s15   ;;  %s595_s14 = sphi %s636_s14, %s770_s14   ;;  %s591_s13 = sphi %s634_s13, %s769_s13   ;;  %s587_s12 = sphi %s632_s12, %s768_s12  }
   0x7   : > { %s31_s19 = sadd.s32 1, %s603_s16  ;;  %s40_s20 = sadd.s32 1, %s595_s14 }
   0x8   : > { %p33_p0 = scmp.ge.s32.totalorder %s31_s19, 2  ;;  %p47_p1 = scmp.ne.s32.totalorder %s595_s14, %s591_s13 }
   0x9   : > { %p48_p2 = scmp.eq.s32.totalorder %s607_s17, 0  ;;  %p53_p3 = scmp.ne.s32.totalorder %s591_s13, %s587_s12 }
   0xa   : > { %s774_s19 = smov (%p33_p0, %s31_s19), 0  ;;  %p54_p5 = scmp.eq.s32.totalorder %s390_s2, 0 }
   0xb   : > { %p673_p4 = por %p48_p2, %p47_p1  ;;  %s35_s22 = ssub.s32 %s603_s16, %s774_s19 }
   0xc   : > { %p121_p6 = scmp.eq.s32.totalorder %s390_s2, 1  ;;  %p38_p7 = scmp.eq.s32.totalorder %s35_s22, 0 }
   0xd   : > { %p679_p8 = por %p54_p5, %p53_p3  ;;  %p127_p10 = scmp.eq.s32.totalorder %s391_s18, 1 }
   0xe   : > { %p683_p9 = por %p121_p6, %p47_p1  ;;  %p393_p12 = scmp.ge.s32.totalorder %s607_s17, 2 }
   0xf   : > { %s688_s25 = scalar_select %p38_p7, %s595_s14, %s40_s20  }
  0x10   : > { %p690_p11 = por %p127_p10, %p53_p3  ;;  %p438_p13 = scmp.lt.s32.totalorder %s607_s17, 2 }
  0x11   : > { %s153_s27 = sand.u32 1, %s595_s14   ;;  %s421_s29 = sshll.u32 %s603_s16, 5 }
  0x12   : > { %s394_s28 = sshll.u32 %s153_s27, 5  ;;  %s163_s5 = scalar_lea.hbm %s760_s0, %s421_s29 }
  0x13   : > { %s157_s6 = scalar_lea.vmem [#allocation3], %s394_s28  ;;  %s164_s8 = sshll.u32 %s163_s5, 4  ;;  %s165_s8 = int_to_ptr.hbm [resolvable:$true] %s164_s8 }
  0x14   : > { %s166_s7 = sshll.u32 %s157_s6, 4  ;;  %p431_p0 = pnand %p438_p13, %p673_p4  ;;  %s167_s7 = int_to_ptr.vmem [resolvable:$true] %s166_s7 }
  0x15   : > { %p397_p1 = scmp.ge.s32.totalorder %s607_s17, 1  ;;  %s154_s9 = scalar_lea.sflag [#allocation4], %s153_s27 }
  0x16   : > { %s609_s10 = smov 64   ;;  %s610_s11 = smov 4  }
  0x17   : > { %433 = dma.hbm_to_vmem [thread:$0]  (!%p431_p0), %s165_s8, 512, %s167_s7, %s154_s9, %s609_s10, %s609_s10, %s610_s11  }
  0x18   : > { %p174_p2 = scmp.lt.s32.totalorder %s607_s17, 3 }
  0x1a   : > { %p175_p3 = pnand %p397_p1, %p174_p2 }
  0x1b   : > { %s706_s2 = sand.u32 (!%p175_p3), 1, %s591_s13  }
  0x1c   : > { %178 = sbr.rel (%p175_p3) target bundleno = 446 (0x1be), region = 32  ;;  %s398_s18 = sshll.u32 (!%p175_p3), %s706_s2, 5 }
  0x1d   : > { %s181_s20 = scalar_lea.sflag (!%p175_p3), [#allocation4], %s706_s2  ;;  %s184_s22 = scalar_lea.vmem (!%p175_p3), [#allocation3], %s398_s18 }
  0x21   : > { %578 = dma.done.wait (%p679_p8), %s181_s20, 512  }
  0x22   : > { %580 = vsyncadd (%p679_p8), %s181_s20, 4294966784  ;;  %v425_v0 = vld [vmem:[%s184_s22 + $0x18] sm:$0xff]  ;;  %v424_v1 = vld [vmem:[%s184_s22 + $0x10] sm:$0xff]  ;;  %vm242_vm0 = vcmask 523264   ;;  %v611_v8 = vmov 64.0   ;;  %s399_s23 = sshll.u32 %s706_s2, 3 }
  0x23   : > { %250 = vmatpush.bf16.msra.mxu0 %v425_v0  ;;  %v423_v2 = vld [vmem:[%s184_s22 + $0x8] sm:$0xff]  ;;  %v422_v3 = vld [vmem:[%s184_s22] sm:$0xff]  ;;  %491 = vrcp.f32 %v611_v8  ;;  %s418_s28 = sshll.u32 %s599_s15, 3  ;;  %s207_s5 = scalar_lea.vmem [#allocation6], %s399_s23 }
  0x24   : > { %v209_v4 = vld [vmem:[%s761_s1] sm:$0xf]  ;;  %s304_s4 = scalar_lea.hbm %s763_s3, %s418_s28  ;;  %s306_s6 = sshll.u32 %s207_s5, 4  ;;  %s307_s6 = int_to_ptr.vmem [resolvable:$true] %s306_s6 }
  0x25   : > { %s308_s7 = sshll.u32 %s304_s4, 4  ;;  %s293_s15 = scalar_lea.sflag [#allocation5], %s706_s2  ;;  %s309_s7 = int_to_ptr.hbm [resolvable:$true] %s308_s7 }
  0x26   : > { %s539_s8 = sshra.s32 %s309_s7, 4  ;;  %s545_s18 = scalar_lea.hbm %s763_s3, 16  ;;  %s540_s8 = int_to_ptr.hbm [resolvable:$true] %s539_s8 }
  0x27   : > { %251 = vmatpush.bf16.msra.mxu0 %v424_v1  ;;  %s541_s9 = scalar_lea.hbm %s540_s8, 8  ;;  %p546_p7 = scmp.lt.s32.totalorder %s540_s8, %s763_s3 }
  0x28   : > { %p542_p4 = scmp.ne.s32.totalorder %s540_s8, %s541_s9  ;;  %p547_p8 = scmp.lt.s32.totalorder %s545_s18, %s541_s9 }
  0x29   : > { %v492_v9 = vpop.eup %491 }
  0x2a   : > { %v263_v10 = vmul.f32 64.0, %v492_v9  ;;  %vm267_vm1 = vweird.f32 %v492_v9  ;;  %p543_p5 = pnand %p542_p4, %p683_p9  ;;  %p548_p10 = por %p547_p8, %p546_p7 }
  0x2b   : > { %252 = vmatpush.bf16.msra.mxu0 %v423_v2 }
  0x2c   : > { %v264_v11 = vsub.f32 1.0, %v263_v10  ;;  %p544_p6 = pneg %p543_p5 }
  0x2e   : > { %v265_v12 = vmul.f32 %v492_v9, %v264_v11  ;;  %p549_p13 = pnand %p548_p10, %p544_p6 }
  0x2f   : > { %253 = vmatpush.bf16.msra.mxu0 %v422_v3 }
  0x30   : > { %v266_v13 = vadd.f32 %v492_v9, %v265_v12 }
  0x32   : > { %416 = vmatmul.msk.bf16.vlgmr.msra.gmra.mxu0 %vm242_vm0, %v209_v4  ;;  %v268_v14 = vsel %vm267_vm1, %v492_v9, %v266_v13 }
  0xaf   : > { %v255_v5 = vpop.f32.mrf.mxu0 }
  0xb0   : > { %v259_v6 = vsel %vm242_vm0, %v255_v5, 0.0 }
  0xb1   : > { %260 = vadd.xlane.f32.xlu0 %v259_v6 }
  0xb7   : > { %v257_v7 = vpop.f32.mrf.mxu0 }
 0x124   : > { %v261_v15 = vpop.xlane.xlu0 %260 }
 0x125   : > { %v269_v16 = vmul.f32 %v268_v14, %v261_v15 }
 0x127   : > { %v270_v17 = vsub.f32 %v255_v5, %v269_v16 }
 0x129   : > { %v271_v18 = vmul.f32 %v270_v17, %v270_v17 }
 0x12b   : > { %v272_v19 = vsel %vm242_vm0, %v271_v18, 0.0 }
 0x12c   : > { %273 = vadd.xlane.f32.xlu0 %v272_v19 }
 0x19f   : > { %v274_v20 = vpop.xlane.xlu0 %273 }
 0x1a0   : > { %v275_v21 = vmul.f32 %v274_v20, %v268_v14 }
 0x1a2   : > { %v276_v22 = vadd.f32 1e-05, %v275_v21 }
 0x1a4   : > { %493 = vrsqrt.f32 %v276_v22  ;;  %vm283_vm3 = vweird.f32 %v276_v22 }
 0x1aa   : > { %v494_v23 = vpop.eup %493 }
 0x1ab   : > { %v278_v24 = vmul.f32 %v494_v23, %v276_v22  ;;  %vm284_vm2 = vweird.f32 %v494_v23 }
 0x1ac   : > { %vm285_vm4 = vmor %vm283_vm3, %vm284_vm2 }
 0x1ad   : > { %v279_v25 = vmul.f32 %v494_v23, %v278_v24 }
 0x1af   : > { %v280_v26 = vmul.f32 0.5, %v279_v25 }
 0x1b1   : > { %v281_v27 = vsub.f32 1.5, %v280_v26 }
 0x1b3   : > { %v282_v28 = vmul.f32 %v494_v23, %v281_v27 }
 0x1b5   : > { %v286_v29 = vsel %vm285_vm4, %v494_v23, %v282_v28 }
 0x1b6   : > { %v287_v30 = vmul.f32 %v286_v29, %v270_v17 }
 0x1b8   : > { %vm288_vm5 = vcmp.ge.f32.partialorder %v287_v30, 0.0  ;;  %v289_v31 = vmul.f32 0.2, %v287_v30 }
 0x1ba   : > { %v290_v32 = vsel %vm288_vm5, %v287_v30, %v289_v31 }
 0x1bb   : > { %291 = vst.msk [vmem:[%s207_s5] sm:$0xff] %vm242_vm0, %v290_v32 }
 0x1bc   : > { %552 = shalt.err (!%p549_p13)
}
 0x1bd   : > { %428 = dma.vmem_to_hbm [thread:$0]  (%p683_p9), %s307_s6, 128, %s309_s7, %s293_s15  }
 0x1be PF: > { %s320_s2 = sand.u32 1, %s587_s12   ;;  %p435_p0 = pnand %p393_p12, %p690_p11 }
 0x1bf   : > { %s321_s21 = scalar_lea.sflag [#allocation5], %s320_s2 }
 0x1c0   : > { %p436_p1 = pneg %p435_p0 }
 0x1c2   : > { %582 = dma.done.wait (%p436_p1), %s321_s21, 128  }
 0x1c3   : > { %584 = vsyncadd (%p436_p1), %s321_s21, 4294967168  ;;  %s19_s17 = sadd.s32 1, %s607_s17   ;;  %s768_s12 = smov %s591_s13 }
 0x1c4   : > { %p16_p2 = scmp.ge.s32.totalorder %s19_s17, 4   ;;  %s769_s13 = smov %s595_s14 }
 0x1c5   : > { %s770_s14 = smov %s688_s25  ;;  %s771_s15 = smov %s603_s16 }
 0x1c6   : > { %s772_s16 = smov %s774_s19  ;;  %18 = sbr.rel (!%p16_p2) target bundleno = 6 (0x6), region = 77 }
 0x1cb   :  { %327 = vsyncpa [#allocation4], 1 }
 0x1cc   :  { %329 = vsyncpa [#allocation4 + $0x1], 1 }
 0x1cd   :  { %330 = vsyncpa [#allocation5], 1 }
 0x1ce   :  { %332 = vsyncpa [#allocation5 + $0x1], 1 }

</bundles_post_ra>
